<compile_context>
chip_gen: v6e
topology: v6e:2x2x1
jax: 0.10.0
libtpu: 0.0.40
codegen_flags: <defaults>
</compile_context>

<pallas_src>
import numpy as np
import jax
import jax.numpy as jnp
from jax.experimental import pallas as pl
from jax.experimental.pallas import tpu as pltpu


# ------------------------------------------------------------------ kernels --

def _fa_sse_resize_kernel(s_ref, t_ref, r_ref, w_ref, o_ref):
    # s_ref: (Nb*Cs, Hi*Wi) student rows (batch-major), lane-dense spatial
    # t_ref: (Nb*Ct, Hi*Wi) teacher rows
    # r_ref: (Ho*Wo, Hi*Wi) bilinear resize operator (applied by contracting Hi*Wi)
    # w_ref: (Ct, Cs)       1x1 channel-align conv weight
    # o_ref: (1, 1)         running sum of squared errors (accumulated over grid)
    ct, cs = w_ref.shape
    nb = s_ref.shape[0] // cs

    @pl.when(pl.program_id(0) == 0)
    def _init():
        o_ref[...] = jnp.zeros_like(o_ref)

    s = s_ref[...].astype(jnp.float32)
    t = t_ref[...].astype(jnp.float32)
    r = r_ref[...].astype(jnp.float32)
    w = w_ref[...].astype(jnp.float32)

    # Resize the whole batch chunk with one lane-dense MXU matmul per tensor
    # (contract the flattened Hi*Wi axis of both operands; no explicit transpose).
    contract_last = (((1,), (1,)), ((), ()))
    s_small = jax.lax.dot_general(s, r, contract_last,
                                  preferred_element_type=jnp.float32)  # (Nb*Cs, HoWo)
    t_small = jax.lax.dot_general(t, r, contract_last,
                                  preferred_element_type=jnp.float32)  # (Nb*Ct, HoWo)

    sse = jnp.zeros((1, 1), jnp.float32)
    for i in range(nb):  # Nb is a small static chunk size -> unrolled
        aligned = jnp.dot(w, s_small[i * cs:(i + 1) * cs, :],
                          preferred_element_type=jnp.float32)          # (Ct, HoWo)
        d = aligned - t_small[i * ct:(i + 1) * ct, :]
        sse = sse + jnp.sum(d * d, keepdims=True)
    o_ref[...] = o_ref[...] + sse


def _fa_sse_kernel(s_ref, t_ref, w_ref, o_ref):
    # Same as above but for scale == 1.0 (no interpolation).
    ct, cs = w_ref.shape
    nb = s_ref.shape[0] // cs

    @pl.when(pl.program_id(0) == 0)
    def _init():
        o_ref[...] = jnp.zeros_like(o_ref)

    s = s_ref[...].astype(jnp.float32)
    t = t_ref[...].astype(jnp.float32)
    w = w_ref[...].astype(jnp.float32)

    sse = jnp.zeros((1, 1), jnp.float32)
    for i in range(nb):
        aligned = jnp.dot(w, s[i * cs:(i + 1) * cs, :],
                          preferred_element_type=jnp.float32)          # (Ct, Hi*Wi)
        d = aligned - t[i * ct:(i + 1) * ct, :]
        sse = sse + jnp.sum(d * d, keepdims=True)
    o_ref[...] = o_ref[...] + sse


# ------------------------------------------------------------------ wrapper --

def _linear_resize_matrix(in_size, out_size):
    """(out_size, in_size) 1-D bilinear operator matching
    F.interpolate(mode='bilinear', align_corners=False)."""
    i = np.arange(out_size, dtype=np.float64)
    src = np.clip((i + 0.5) * (in_size / out_size) - 0.5, 0.0, in_size - 1)
    i0 = np.floor(src).astype(np.int64)
    i1 = np.minimum(i0 + 1, in_size - 1)
    w1 = src - i0
    m = np.zeros((out_size, in_size), np.float32)
    np.add.at(m, (np.arange(out_size), i0), (1.0 - w1).astype(np.float32))
    np.add.at(m, (np.arange(out_size), i1), w1.astype(np.float32))
    return m


def _pick_batch_chunk(n, cs, ct, hiwi, budget_bytes=8 << 20):
    """Largest batch chunk whose double-buffered blocks fit a VMEM budget and
    keep the sublane block dims either full-extent or multiples of 8."""
    bytes_per_elem = 2 * (cs + ct) * hiwi * 4
    fallback = n
    for nb in range(n, 0, -1):
        if n % nb:
            continue
        tile_ok = (nb == n) or ((nb * cs) % 8 == 0 and (nb * ct) % 8 == 0)
        if not tile_ok:
            continue
        fallback = nb
        if nb * bytes_per_elem <= budget_bytes:
            return nb
    return fallback


def _alignment_mse(s, t, w, scale):
    """MSE between channel-aligned, bilinearly-scaled student and scaled teacher."""
    n, cs, hi, wi = s.shape
    ct = t.shape[1]
    if w is None:                       # module allows channel_align=None
        assert cs == ct, "channel counts must match when channel_align is None"
        w = jnp.eye(ct, dtype=jnp.float32)
    w = w.astype(jnp.float32)

    hiwi = hi * wi
    s2 = s.reshape(n * cs, hiwi)        # lane-dense, batch-major rows
    t2 = t.reshape(n * ct, hiwi)

    nb = _pick_batch_chunk(n, cs, ct, hiwi)
    grid = (n // nb,)
    out_shape = jax.ShapeDtypeStruct((1, 1), jnp.float32)
    out_spec = pl.BlockSpec((1, 1), lambda i: (0, 0))
    cparams = pltpu.CompilerParams(dimension_semantics=("arbitrary",))

    if scale != 1.0:
        ho = int(np.floor(hi * scale))
        wo = int(np.floor(wi * scale))
        r = jnp.asarray(np.kron(_linear_resize_matrix(hi, ho),
                                _linear_resize_matrix(wi, wo)))          # (Ho*Wo, Hi*Wi)
        sse = pl.pallas_call(
            _fa_sse_resize_kernel,
            out_shape=out_shape,
            grid=grid,
            in_specs=[
                pl.BlockSpec((nb * cs, hiwi), lambda i: (i, 0)),
                pl.BlockSpec((nb * ct, hiwi), lambda i: (i, 0)),
                pl.BlockSpec((ho * wo, hiwi), lambda i: (0, 0)),
                pl.BlockSpec((ct, cs), lambda i: (0, 0)),
            ],
            out_specs=out_spec,
            compiler_params=cparams,
        )(s2, t2, r, w)
    else:
        ho, wo = hi, wi
        sse = pl.pallas_call(
            _fa_sse_kernel,
            out_shape=out_shape,
            grid=grid,
            in_specs=[
                pl.BlockSpec((nb * cs, hiwi), lambda i: (i, 0)),
                pl.BlockSpec((nb * ct, hiwi), lambda i: (i, 0)),
                pl.BlockSpec((ct, cs), lambda i: (0, 0)),
            ],
            out_specs=out_spec,
            compiler_params=cparams,
        )(s2, t2, w)

    return sse[0, 0] / (n * ct * ho * wo)


def feature_alignment_loss(student_features, teacher_features, align_weights=None,
                           scales=(0.25,)):
    """Pallas implementation of FeatureAlignmentLoss.forward."""
    assert len(student_features) == len(teacher_features)
    total = jnp.zeros((), jnp.float32)
    count = 0
    for idx, (s, t) in enumerate(zip(student_features, teacher_features)):
        w = None if align_weights is None else align_weights[idx]
        for scale in scales:
            total = total + _alignment_mse(s, t, w, scale)
            count += 1
    return total / count


# ---------------------------------------------------------------- reference --

def _bilinear_resize_ref(x, out_h, out_w):
    """Pure-JAX bilinear resize matching F.interpolate(align_corners=False)."""
    _, _, in_h, in_w = x.shape

    def coords(out_size, in_size):
        src = (jnp.arange(out_size, dtype=jnp.float32) + 0.5) * (in_size / out_size) - 0.5
        src = jnp.clip(src, 0.0, in_size - 1)
        i0 = jnp.floor(src).astype(jnp.int32)
        i1 = jnp.minimum(i0 + 1, in_size - 1)
        return i0, i1, src - i0.astype(jnp.float32)

    h0, h1, fh = coords(out_h, in_h)
    w0, w1, fw = coords(out_w, in_w)
    rows = (x[:, :, h0, :] * (1.0 - fh)[None, None, :, None]
            + x[:, :, h1, :] * fh[None, None, :, None])
    return (rows[:, :, :, w0] * (1.0 - fw)[None, None, None, :]
            + rows[:, :, :, w1] * fw[None, None, None, :])


def feature_alignment_loss_ref(student_features, teacher_features, align_weights, scales):
    total = 0.0
    count = 0
    for idx, (s, t) in enumerate(zip(student_features, teacher_features)):
        for scale in scales:
            if scale != 1.0:
                ho = int(np.floor(s.shape[2] * scale))
                wo = int(np.floor(s.shape[3] * scale))
                s_s = _bilinear_resize_ref(s, ho, wo)
                t_s = _bilinear_resize_ref(t, ho, wo)
            else:
                s_s, t_s = s, t
            if align_weights is not None:
                s_a = jnp.einsum('oc,nchw->nohw', align_weights[idx], s_s)
            else:
                s_a = s_s
            total = total + jnp.mean((s_a - t_s) ** 2)
            count += 1
    return total / count


# --------------------------------------------------------------------- main --

if __name__ == "__main__":
    key = jax.random.PRNGKey(0)
    ks = jax.random.split(key, 6)
    scales = (0.25, 1.0)

    # Two feature levels (NCHW, like the PyTorch module).
    s0 = jax.random.normal(ks[0], (2, 4, 16, 16), jnp.float32)
    t0 = jax.random.normal(ks[1], (2, 8, 16, 16), jnp.float32)
    s1 = jax.random.normal(ks[2], (2, 8, 32, 32), jnp.float32)
    t1 = jax.random.normal(ks[3], (2, 16, 32, 32), jnp.float32)
    # 1x1 Conv2d weights (bias=False) as (out_ch, in_ch) matrices.
    w0 = jax.random.normal(ks[4], (8, 4), jnp.float32) * 0.1
    w1 = jax.random.normal(ks[5], (16, 8), jnp.float32) * 0.1

    student = [s0, s1]
    teacher = [t0, t1]
    weights = [w0, w1]

    loss = feature_alignment_loss(student, teacher, weights, scales)
    loss = jax.block_until_ready(loss)

    ref = feature_alignment_loss_ref(student, teacher, weights, scales)
    err = abs(float(loss) - float(ref))
    rel = err / max(abs(float(ref)), 1e-8)
    if err > 1e-4 and rel > 1e-4:
        raise AssertionError(
            f"Pallas FeatureAlignmentLoss mismatch: {float(loss)} vs ref {float(ref)}")
    print("KERNEL_OK")
</pallas_src>

<mosaic_0001>
module attributes {stable_mosaic.version = 11 : i64} {
  func.func @_fa_sse_resize_kernel(%arg0: i32, %arg1: memref<8x256xf32, #tpu.memory_space<vmem>>, %arg2: memref<16x256xf32, #tpu.memory_space<vmem>>, %arg3: memref<16x256xf32, #tpu.memory_space<vmem>>, %arg4: memref<8x4xf32, #tpu.memory_space<vmem>>, %arg5: memref<1x1xf32, #tpu.memory_space<vmem>>) attributes {dimension_semantics = [#tpu.dimension_semantics<arbitrary>], iteration_bounds = array<i64: 1>, scalar_prefetch = 0 : i64, scratch_operands = 0 : i64, tpu.core_type = #tpu.core_type<tc>, window_params = [{transform_indices = @transform_0, window_bounds = array<i64: 8, 256>}, {transform_indices = @transform_1, window_bounds = array<i64: 16, 256>}, {pipeline_mode = #tpu.pipeline_mode<synchronous>, transform_indices = @transform_2, window_bounds = array<i64: 16, 256>}, {pipeline_mode = #tpu.pipeline_mode<synchronous>, transform_indices = @transform_3, window_bounds = array<i64: 8, 4>}, {pipeline_mode = #tpu.pipeline_mode<synchronous>, transform_indices = @transform_4, window_bounds = array<i64: 1, 1>}]} {
    %c0_i32 = arith.constant 0 : i32
    %0 = arith.cmpi eq, %arg0, %c0_i32 : i32
    %1 = arith.extui %0 : i1 to i32
    %c0_i32_0 = arith.constant 0 : i32
    %2 = arith.cmpi ne, %1, %c0_i32_0 : i32
    scf.if %2 {
      %cst_18 = arith.constant 0.000000e+00 : f32
      %35 = vector.broadcast %cst_18 : f32 to vector<1x1xf32>
      %c0_19 = arith.constant 0 : index
      %c0_20 = arith.constant 0 : index
      %36 = vector.load %arg5[%c0_19, %c0_20] : memref<1x1xf32, #tpu.memory_space<vmem>>, vector<1x1xf32>
      tpu.vector_store %arg5[%c0_19, %c0_20], %35 {strides = array<i32>} : memref<1x1xf32, #tpu.memory_space<vmem>>, vector<1x1xf32>,
    } else {
    }
    %c0 = arith.constant 0 : index
    %c0_1 = arith.constant 0 : index
    %3 = vector.load %arg1[%c0, %c0_1] : memref<8x256xf32, #tpu.memory_space<vmem>>, vector<8x256xf32>
    %c0_2 = arith.constant 0 : index
    %c0_3 = arith.constant 0 : index
    %4 = vector.load %arg2[%c0_2, %c0_3] : memref<16x256xf32, #tpu.memory_space<vmem>>, vector<16x256xf32>
    %c0_4 = arith.constant 0 : index
    %c0_5 = arith.constant 0 : index
    %5 = vector.load %arg3[%c0_4, %c0_5] : memref<16x256xf32, #tpu.memory_space<vmem>>, vector<16x256xf32>
    %c0_6 = arith.constant 0 : index
    %c0_7 = arith.constant 0 : index
    %6 = vector.load %arg4[%c0_6, %c0_7] : memref<8x4xf32, #tpu.memory_space<vmem>>, vector<8x4xf32>
    %cst = arith.constant dense<0.000000e+00> : vector<8x16xf32>
    %7 = tpu.matmul %3, %5, %cst {dimension_numbers = #tpu.dot_dimension_numbers<[1], [1], [0], [0], [0, 0, 1, 0], [], []>} : vector<8x256xf32>, vector<16x256xf32>, vector<8x16xf32> -> vector<8x16xf32>
    %cst_8 = arith.constant dense<0.000000e+00> : vector<16x16xf32>
    %8 = tpu.matmul %4, %5, %cst_8 {dimension_numbers = #tpu.dot_dimension_numbers<[1], [1], [0], [0], [0, 0, 1, 0], [], []>} : vector<16x256xf32>, vector<16x256xf32>, vector<16x16xf32> -> vector<16x16xf32>
    %cst_9 = arith.constant 0.000000e+00 : f32
    %9 = vector.broadcast %cst_9 : f32 to vector<1x1xf32>
    %10 = vector.extract_strided_slice %7 {offsets = [0, 0], sizes = [4, 16], strides = [1, 1]} : vector<8x16xf32> to vector<4x16xf32>
    %cst_10 = arith.constant dense<0.000000e+00> : vector<8x16xf32>
    %11 = tpu.matmul %6, %10, %cst_10 {dimension_numbers = #tpu.dot_dimension_numbers<[1], [0], [0], [1], [0, 0, 1, 1], [], []>} : vector<8x4xf32>, vector<4x16xf32>, vector<8x16xf32> -> vector<8x16xf32>
    %12 = vector.extract_strided_slice %8 {offsets = [0, 0], sizes = [8, 16], strides = [1, 1]} : vector<16x16xf32> to vector<8x16xf32>
    %13 = arith.subf %11, %12 : vector<8x16xf32>
    %14 = arith.mulf %13, %13 : vector<8x16xf32>
    %15 = vector.shape_cast %14 : vector<8x16xf32> to vector<1x8x16xf32>
    %cst_11 = arith.constant dense<0.000000e+00> : vector<1xf32>
    %16 = vector.multi_reduction <add>, %15, %cst_11 [1, 2] : vector<1x8x16xf32> to vector<1xf32>
    %17 = vector.shape_cast %16 : vector<1xf32> to vector<1x1x1xf32>
    %18 = vector.extract %17[0, 0, 0] : f32 from vector<1x1x1xf32>
    %19 = vector.broadcast %18 : f32 to vector<1x1xf32>
    %20 = arith.addf %9, %19 : vector<1x1xf32>
    %21 = vector.extract_strided_slice %7 {offsets = [4, 0], sizes = [4, 16], strides = [1, 1]} : vector<8x16xf32> to vector<4x16xf32>
    %cst_12 = arith.constant dense<0.000000e+00> : vector<8x16xf32>
    %22 = tpu.matmul %6, %21, %cst_12 {dimension_numbers = #tpu.dot_dimension_numbers<[1], [0], [0], [1], [0, 0, 1, 1], [], []>} : vector<8x4xf32>, vector<4x16xf32>, vector<8x16xf32> -> vector<8x16xf32>
    %23 = vector.extract_strided_slice %8 {offsets = [8, 0], sizes = [8, 16], strides = [1, 1]} : vector<16x16xf32> to vector<8x16xf32>
    %24 = arith.subf %22, %23 : vector<8x16xf32>
    %25 = arith.mulf %24, %24 : vector<8x16xf32>
    %26 = vector.shape_cast %25 : vector<8x16xf32> to vector<1x8x16xf32>
    %cst_13 = arith.constant dense<0.000000e+00> : vector<1xf32>
    %27 = vector.multi_reduction <add>, %26, %cst_13 [1, 2] : vector<1x8x16xf32> to vector<1xf32>
    %28 = vector.shape_cast %27 : vector<1xf32> to vector<1x1x1xf32>
    %29 = vector.extract %28[0, 0, 0] : f32 from vector<1x1x1xf32>
    %30 = vector.broadcast %29 : f32 to vector<1x1xf32>
    %31 = arith.addf %20, %30 : vector<1x1xf32>
    %c0_14 = arith.constant 0 : index
    %c0_15 = arith.constant 0 : index
    %32 = vector.load %arg5[%c0_14, %c0_15] : memref<1x1xf32, #tpu.memory_space<vmem>>, vector<1x1xf32>
    %33 = arith.addf %32, %31 : vector<1x1xf32>
    %c0_16 = arith.constant 0 : index
    %c0_17 = arith.constant 0 : index
    %34 = vector.load %arg5[%c0_16, %c0_17] : memref<1x1xf32, #tpu.memory_space<vmem>>, vector<1x1xf32>
    tpu.vector_store %arg5[%c0_16, %c0_17], %33 {strides = array<i32>} : memref<1x1xf32, #tpu.memory_space<vmem>>, vector<1x1xf32>,
    return
  }
  func.func @transform_0(%arg0: i32) -> (i32, i32) {
    %c0_i32 = arith.constant 0 : i32
    %c0_i32_0 = arith.constant 0 : i32
    return %arg0, %c0_i32 : i32, i32
  }
  func.func @transform_1(%arg0: i32) -> (i32, i32) {
    %c0_i32 = arith.constant 0 : i32
    %c0_i32_0 = arith.constant 0 : i32
    return %arg0, %c0_i32 : i32, i32
  }
  func.func @transform_2(%arg0: i32) -> (i32, i32) {
    %c0_i32 = arith.constant 0 : i32
    %c0_i32_0 = arith.constant 0 : i32
    %c0_i32_1 = arith.constant 0 : i32
    return %c0_i32, %c0_i32_0 : i32, i32
  }
  func.func @transform_3(%arg0: i32) -> (i32, i32) {
    %c0_i32 = arith.constant 0 : i32
    %c0_i32_0 = arith.constant 0 : i32
    %c0_i32_1 = arith.constant 0 : i32
    return %c0_i32, %c0_i32_0 : i32, i32
  }
  func.func @transform_4(%arg0: i32) -> (i32, i32) {
    %c0_i32 = arith.constant 0 : i32
    %c0_i32_0 = arith.constant 0 : i32
    %c0_i32_1 = arith.constant 0 : i32
    return %c0_i32, %c0_i32_0 : i32, i32
  }
}

</mosaic_0001>

<bundles_post_ra>
// kernel: tpu_custom_call.1
= control target key start
LH: loop header
LB: loop body
LE: loop exit
PB: predicated region body
PF: predicated region fallthrough
CT: control target
= control target key end

     0   :  { %9 = vsyncpa [#allocation3], 0  ;;  %s587_s0 = inlined_call_operand.hbm [shape: f32[8,256], index: 0, kind: input, shape index: {}]   ;;  %s588_s1 = inlined_call_operand.hbm [shape: f32[16,256], index: 1, kind: input, shape index: {}]   ;;  %s589_s2 = inlined_call_operand.hbm [shape: f32[16,256], index: 2, kind: input, shape index: {}]   ;;  %s590_s3 = inlined_call_operand.vmem [shape: f32[8,4], index: 3, kind: input, shape index: {}]   ;;  %s591_s4 = inlined_call_operand.hbm [shape: f32[1,1], index: 4, kind: output, shape index: {}]  }
   0x1   :  { %10 = vsyncpa [#allocation6], 0 }
   0x2   :  { %11 = vsyncpa [#allocation4], 0  ;;  %s535_s15 = smov [#allocation5]  }
   0x3   :  { %s27_s16 = sshll.u32 %s535_s15, 4  ;;  %s28_s16 = int_to_ptr.vmem [resolvable:$true] %s27_s16 }
   0x4   :  { %s457_s17 = scalar_lea.vmem %s28_s16, 512  ;;  %p462_p1 = scmp.lt.s32.totalorder %s28_s16, %s28_s16 }
   0x5   :  { %p458_p0 = scmp.ne.s32.totalorder %s28_s16, %s457_s17  ;;  %p463_p2 = scmp.lt.s32.totalorder %s457_s17, %s457_s17 }
   0x7   :  { %p464_p3 = por %p463_p2, %p462_p1 }
   0x9   :  { %p465_p4 = pnand %p464_p3, %p458_p0 }
   0xb   :  { %468 = shalt.err (!%p465_p4)
}
   0xc   :  { %s536_s18 = smov 256   ;;  %s537_s19 = smov 16  }
   0xd   :  { %33 = dma.hbm_to_vmem [thread:$0]  %s588_s1, 512, %s28_s16, [#allocation6], %s536_s18, %s536_s18, %s537_s19  }
   0xe   :  { %s538_s22 = smov [#allocation2]   ;;  %s539_s24 = smov [#allocation7]  }
   0xf   :  { %s18_s23 = sshll.u32 %s538_s22, 4  ;;  %s39_s25 = sshll.u32 %s539_s24, 4  ;;  %s19_s23 = int_to_ptr.vmem [resolvable:$true] %s18_s23  ;;  %s40_s25 = int_to_ptr.vmem [resolvable:$true] %s39_s25 }
  0x10   :  { %s477_s26 = scalar_lea.vmem %s19_s23, 256  ;;  %p482_p6 = scmp.lt.s32.totalorder %s19_s23, %s19_s23 }
  0x11   :  { %p478_p5 = scmp.ne.s32.totalorder %s19_s23, %s477_s26  ;;  %p483_p7 = scmp.lt.s32.totalorder %s477_s26, %s477_s26 }
  0x13   :  { %p484_p8 = por %p483_p7, %p482_p6 }
  0x15   :  { %p485_p9 = pnand %p484_p8, %p478_p5 }
  0x17   :  { %488 = shalt.err (!%p485_p9)
}
  0x18   :  { %21 = dma.hbm_to_vmem [thread:$0]  %s587_s0, 256, %s19_s23, [#allocation3]  }
  0x19   :  { %s497_s29 = scalar_lea.vmem %s40_s25, 512  ;;  %p502_p11 = scmp.lt.s32.totalorder %s40_s25, %s40_s25 }
  0x1a   :  { %p498_p10 = scmp.ne.s32.totalorder %s40_s25, %s497_s29  ;;  %p503_p12 = scmp.lt.s32.totalorder %s497_s29, %s497_s29 }
  0x1c   :  { %p504_p13 = por %p503_p12, %p502_p11 }
  0x1e   :  { %p505_p0 = pnand %p504_p13, %p498_p10 }
  0x20   :  { %508 = shalt.err (!%p505_p0)
}
  0x21   :  { %45 = dma.hbm_to_vmem [thread:$0]  %s589_s2, 512, %s40_s25, [#allocation6], %s536_s18, %s536_s18, %s537_s19  }
  0x22   :  { %529 = dma.done.wait [#allocation3], 256  }
  0x23   :  { %530 = vsyncadd [#allocation3], 4294967040 }
  0x24   :  { %531 = dma.done.wait [#allocation6], 1024  }
  0x25   :  { %532 = vsyncadd [#allocation6], 4294966272  ;;  %v72_v0 = vld [vmem:[#allocation7 + $0x18] sm:$0xff]  ;;  %v71_v1 = vld [vmem:[#allocation7 + $0x10] sm:$0xff]  ;;  %v540_v8 = vmov 0.0   ;;  %vm61_vm0 = vcmask 0  }
  0x26   :  { %v70_v2 = vld [vmem:[#allocation7 + $0x8] sm:$0xff]  ;;  %102 = vmatprep.subr.mxu0 %v72_v0  ;;  %v64_v3 = vld [vmem:[#allocation2 + $0x8] sm:$0xff]  ;;  %172 = vmatprep.subr.mxu1 %v72_v0  ;;  %v69_v4 = vld [vmem:[#allocation7] sm:$0xff]  ;;  %vm541_vm1 = vmmov 0   ;;  %62 = vst.msk [vmem:[#allocation8] sm:$0x1] %vm61_vm0, %v540_v8 }
  0x27   :  { %103 = vmatpush1.xpose.msra.mxu0 %v71_v1  ;;  %138 = vmatprep.mubr.f32.mxu0 %v64_v3  ;;  %v63_v5 = vld [vmem:[#allocation2] sm:$0xff]  ;;  %v66_v6 = vld [vmem:[#allocation5 + $0x8] sm:$0xff]  ;;  %v65_v7 = vld [vmem:[#allocation5] sm:$0xff]  ;;  %vm223_vm2 = vcmask 1043456   ;;  %vm219_vm3 = vcmask 31744   ;;  %vm299_vm4 = vcmask 130048  }
  0x28   :  { %104 = vmatprep.subr.mxu0 %v70_v2  ;;  %173 = vmatpush1.xpose.msra.mxu1 %v71_v1  ;;  %v68_v9 = vld [vmem:[#allocation5 + $0x18] sm:$0xff]  ;;  %v67_v10 = vld [vmem:[#allocation5 + $0x10] sm:$0xff]  ;;  %s542_s6 = smov [#allocation8]  }
  0x29   :  { %174 = vmatprep.subr.mxu1 %v70_v2  ;;  %208 = vmatprep.mubr.f32.mxu1 %v66_v6  ;;  %v73_v11 = vld [vmem:[%s590_s3] sm:$0xff]  ;;  %s409_s7 = sshll.u32 %s542_s6, 4  ;;  %s410_s7 = int_to_ptr.vmem [resolvable:$true] %s409_s7 }
  0x2a   :  { %s509_s8 = scalar_lea.vmem %s410_s7, 16  ;;  %s513_s9 = scalar_lea.vmem %s410_s7, 32 }
  0x2b   :  { %105 = vmatpush1.xpose.msra.mxu0 %v69_v4  ;;  %p510_p1 = scmp.ne.s32.totalorder %s410_s7, %s509_s8  ;;  %p514_p2 = scmp.lt.s32.totalorder %s410_s7, %s410_s7 }
  0x2c   :  { %175 = vmatpush1.xpose.msra.mxu1 %v69_v4  ;;  %427 = vmatprep.subr.mxu0 %v540_v8  ;;  %p515_p3 = scmp.lt.s32.totalorder %s513_s9, %s509_s8 }
  0x2d   :  { %v399_v45 = vld [vmem:[#allocation8] sm:$0x1] }
  0x2e   :  { %139 = vmatmul.mubr.f32.vlgmr.msra.gmra.mxu0 %v63_v5  ;;  %p516_p4 = por %p515_p3, %p514_p2 }
  0x2f   :  { %209 = vmatmul.mubr.f32.vlgmr.msra.gmra.mxu1 %v65_v7  ;;  %429 = vmatprep.mubr.msk.f32.mxu0 %vm541_vm1, %v540_v8 }
  0x30   :  { %213 = vmatprep.mubr.f32.mxu1 %v68_v9  ;;  %p517_p5 = pnand %p516_p4, %p510_p1 }
  0x33   :  { %214 = vmatmul.mubr.f32.gmra.mxu1 %v67_v10 }
  0xee   :  { %v140_v12 = vpop.f32.mrf.mxu0 }
  0xef   :  { %v312_v13 = vrot.slane %v140_v12, 4  ;;  %428 = vmatpush3.msk.msra.mxu0 %vm223_vm2, %v140_v12  ;;  %v210_v15 = vpop.f32.mrf.mxu1 }
  0xf0   :  { %v142_v14 = vpop.f32.mrf.mxu0  ;;  %430 = vmatmul.mubr.msk.f32.vlgmr.msra.gmra.mxu0 %vm219_vm3, %v73_v11  ;;  %432 = vmatprep.subr.mxu0 %v540_v8 }
  0xf1   :  { %433 = vmatpush3.msk.msra.mxu0 %vm223_vm2, %v312_v13  ;;  %434 = vmatprep.mubr.msk.f32.mxu0 %vm541_vm1, %v540_v8  ;;  %v212_v16 = vpop.f32.mrf.mxu1 }
  0xf3   :  { %v215_v17 = vpop.f32.mrf.mxu1 }
  0xf4   :  { %435 = vmatmul.mubr.msk.f32.vlgmr.msra.gmra.mxu0 %vm219_vm3, %v73_v11 }
  0xf5   :  { %v217_v18 = vpop.f32.mrf.mxu1 }
 0x1b0   :  { %v293_v19 = vpop.f32.mrf.mxu0 }
 0x1b1   :  { %v297_v20 = vsub.f32 %v293_v19, %v210_v15 }
 0x1b2   :  { %v431_v21 = vpop.f32.mrf.mxu0 }
 0x1b3   :  { %v298_v22 = vmul.f32 %v297_v20, %v297_v20 }
 0x1b4   :  { %v381_v23 = vpop.f32.mrf.mxu0 }
 0x1b5   :  { %v385_v24 = vsub.f32 %v381_v23, %v215_v17  ;;  %v300_v25 = vsel %vm299_vm4, %v298_v22, 0.0 }
 0x1b6   :  { %301 = vadd.xlane.f32.xlu0 %v300_v25  ;;  %v436_v26 = vpop.f32.mrf.mxu0 }
 0x1b7   :  { %v386_v27 = vmul.f32 %v385_v24, %v385_v24 }
 0x1b9   :  { %v387_v28 = vsel %vm299_vm4, %v386_v27, 0.0 }
 0x1ba   :  { %388 = vadd.xlane.f32.xlu0 %v387_v28 }
 0x23f   :  { %v302_v29 = vpop.xlane.xlu0 %301 }
 0x240   :  { %v303_v30 = vrot.slane %v302_v29, 4 }
 0x242   :  { %v304_v31 = vadd.f32 %v303_v30, %v302_v29 }
 0x243   :  { %v389_v32 = vpop.xlane.xlu0 %388 }
 0x244   :  { %v305_v33 = vrot.slane %v304_v31, 2  ;;  %v390_v34 = vrot.slane %v389_v32, 4 }
 0x246   :  { %v391_v35 = vadd.f32 %v390_v34, %v389_v32  ;;  %v306_v36 = vadd.f32 %v305_v33, %v304_v31 }
 0x248   :  { %v392_v37 = vrot.slane %v391_v35, 2  ;;  %v307_v38 = vrot.slane %v306_v36, 1 }
 0x24a   :  { %v393_v39 = vadd.f32 %v392_v37, %v391_v35  ;;  %v308_v40 = vadd.f32 %v307_v38, %v306_v36 }
 0x24c   :  { %437 = vpush %v308_v40  ;;  %v394_v41 = vrot.slane %v393_v39, 1 }
 0x24e   :  { %v395_v42 = vadd.f32 %v394_v41, %v393_v39 }
 0x250   :  { %439 = vpush %v395_v42 }
 0x27d   :  { %s438_s3 = spop %437 }
 0x27e   :  { %v310_v43 = vstv %s438_s3 }
 0x281   :  { %s440_s5 = spop %439 }
 0x282   :  { %v397_v44 = vstv %s440_s5 }
 0x283   :  { %v398_v46 = vadd.f32 %v397_v44, %v310_v43 }
 0x285   :  { %v400_v47 = vadd.f32 %v399_v45, %v398_v46 }
 0x287   :  { %402 = vst.msk [vmem:[#allocation8] sm:$0x1] %vm61_vm0, %v400_v47 }
 0x288   :  { %520 = shalt.err (!%p517_p5)
}
 0x289   :  { %412 = dma.vmem_to_hbm [thread:$0]  %s410_s7, 16, %s591_s4, [#allocation4]  }
 0x28a   :  { %533 = dma.done.wait [#allocation4], 16  }
 0x28b   :  { %534 = vsyncadd [#allocation4], 4294967280 }
 0x28c   :  { %416 = vsyncpa [#allocation3], 1 }
 0x28d   :  { %417 = vsyncpa [#allocation6], 1 }
 0x28e   :  { %418 = vsyncpa [#allocation4], 1 }

</bundles_post_ra>
